<compile_context>
chip_gen: v6e
topology: v6e:2x2x1
jax: 0.10.0
libtpu: 0.0.40
codegen_flags: <defaults>
</compile_context>

<pallas_src>
import jax
import jax.numpy as jnp
from jax.experimental import pallas as pl
from jax.experimental.pallas import tpu as pltpu

HIDDEN = 128            # nn.Linear(input_dim, 128) / nn.Linear(128, 128)
MAX_BLOCK_B = 2048      # cap on the batch tile (512 -> ~85%, 1024 -> ~86% of
                        # HBM roofline; VMEM budget clamps it further)
_VMEM_HEADROOM = 0.75   # fraction of physical VMEM the kernel may use
                        # (~48 MiB on v7x's 64 MiB/TC, ~96 MiB on v5e/v6e)


def _round_up(x, m):
    return ((x + m - 1) // m) * m


def _round_down(x, m):
    return (x // m) * m


def _vmem_capacity_bytes():
    """Per-TensorCore VMEM capacity; conservative (v7x) fallback if unknown."""
    try:
        return int(pltpu.get_tpu_info().vmem_capacity_bytes)
    except Exception:
        return 64 << 20  # v7x per-TC VMEM — never over-allocates on any chip


def _num_tensorcores():
    """Best-effort TensorCores-per-chip (2 on v7x, 1 on v5e/v6e)."""
    try:
        info = pltpu.get_tpu_info()
        for name in ("num_cores", "num_tensorcores", "tensorcore_count",
                     "cores_per_chip"):
            v = getattr(info, name, None)
            if isinstance(v, int) and v >= 1:
                return v
    except Exception:
        pass
    return 1  # safe default: plain "parallel" is valid everywhere


def _mlp_kernel(x_ref, w1_ref, b1_ref, w2_ref, b2_ref, o_ref):
    # x_ref:  (TB, D)     bf16/f32 activation tile (pipelined along the grid)
    # w1_ref: (D, 128)    fc1 weight, VMEM-resident across grid steps
    # b1_ref: (1, 128)    fc1 bias, f32
    # w2_ref: (128, 128)  fc2 weight, VMEM-resident
    # b2_ref: (1, 128)    fc2 bias, f32
    # o_ref:  (TB, 128)
    x = x_ref[...]

    # fc1 on the MXU with f32 accumulation; bias + ReLU on the VPU in f32.
    h = jnp.dot(x, w1_ref[...], preferred_element_type=jnp.float32)
    h = jnp.maximum(h + b1_ref[...], 0.0)

    # fc2: hidden activation back through the MXU in the weight dtype (bf16),
    # f32 accumulation, f32 epilogue, single cast at the final store.
    y = jnp.dot(h.astype(w2_ref.dtype), w2_ref[...],
                preferred_element_type=jnp.float32)
    y = jnp.maximum(y + b2_ref[...], 0.0)

    o_ref[...] = y.astype(o_ref.dtype)


def init_params(key, input_dim, dtype=jnp.bfloat16):
    """Init params once, already in kernel layout / dtype (no per-call casts).

    Returns (w1, b1, w2, b2):
      w1: (input_dim, 128) `dtype`   b1: (1, 128) f32
      w2: (128, 128)       `dtype`   b2: (1, 128) f32
    Weights are stored transposed vs. torch nn.Linear so the kernel computes
    y = x @ W + b. Uniform init mirrors torch's default Linear range.
    """
    k1, k2, k3, k4 = jax.random.split(key, 4)
    lim1 = 1.0 / jnp.sqrt(input_dim)
    lim2 = 1.0 / jnp.sqrt(HIDDEN)
    w1 = jax.random.uniform(k1, (input_dim, HIDDEN), jnp.float32, -lim1, lim1)
    b1 = jax.random.uniform(k2, (HIDDEN,), jnp.float32, -lim1, lim1)
    w2 = jax.random.uniform(k3, (HIDDEN, HIDDEN), jnp.float32, -lim2, lim2)
    b2 = jax.random.uniform(k4, (HIDDEN,), jnp.float32, -lim2, lim2)
    return (
        w1.astype(dtype),
        b1.reshape(1, HIDDEN).astype(jnp.float32),
        w2.astype(dtype),
        b2.reshape(1, HIDDEN).astype(jnp.float32),
    )


def _pick_batch_tile(B, D, x_bytes, out_bytes, w_bytes, block_b_cap,
                     vmem_budget, n_cores):
    """Largest batch tile that fits the VMEM budget, packing-aligned."""
    # Sublane packing: f32 -> 8 rows, bf16 -> 16, int8/fp8 -> 32.
    row_align = 8 * max(1, 4 // max(1, x_bytes))

    # Conservative VMEM model (assumes params are double-buffered even though
    # we request single buffering): 2 x-tiles + 2 out-tiles + 2 param copies.
    param_bytes = 2 * ((D * HIDDEN + HIDDEN * HIDDEN) * w_bytes
                       + 2 * HIDDEN * 4)
    per_row = 2 * D * x_bytes + 2 * HIDDEN * out_bytes
    tb = max(row_align, (vmem_budget - param_bytes) // per_row)
    tb = min(tb, block_b_cap)
    tb = max(row_align, _round_down(tb, row_align))

    if tb >= B:
        return B  # single tile covering the whole batch (block == full dim)

    # v7x: balance work across the two TensorCores -> grid length a multiple
    # of the core count (best effort, never exceeding the VMEM-safe tile).
    if n_cores >= 2:
        n_tiles = pl.cdiv(B, tb)
        if n_tiles > 1 and n_tiles % n_cores:
            n_target = _round_up(n_tiles, n_cores)
            tb_bal = _round_up(pl.cdiv(B, n_target), row_align)
            if row_align <= tb_bal <= tb:
                tb = tb_bal
    return tb


def base_network_forward(x, params, *, block_b=MAX_BLOCK_B, out_dtype=None,
                         vmem_limit_bytes=None, use_core_parallel=None):
    """Pallas forward: relu(relu(x.view(B,-1) @ W1 + b1) @ W2 + b2).

    x:         (B, ...) any trailing shape; flattened to (B, D).
    params:    (w1, b1, w2, b2) from init_params (already in kernel layout).
    out_dtype: defaults to x's dtype (bf16 output halves writeback bytes in
               this HBM-bound kernel); pass jnp.float32 if the consumer needs it.
    """
    w1, b1, w2, b2 = params
    B = x.shape[0]
    x2d = x.reshape(B, -1)
    D = x2d.shape[1]
    assert w1.shape == (D, HIDDEN), (w1.shape, D)

    out_dtype = x2d.dtype if out_dtype is None else out_dtype
    x_bytes = jnp.dtype(x2d.dtype).itemsize
    w_bytes = jnp.dtype(w1.dtype).itemsize
    out_bytes = jnp.dtype(out_dtype).itemsize

    if use_core_parallel is None:
        n_cores = _num_tensorcores()
    else:
        n_cores = 2 if use_core_parallel else 1

    vmem_budget = int(_vmem_capacity_bytes() * _VMEM_HEADROOM)
    if vmem_limit_bytes is None:
        vmem_limit_bytes = vmem_budget

    tb = _pick_batch_tile(B, D, x_bytes, out_bytes, w_bytes, block_b,
                          vmem_budget, n_cores)
    grid = (pl.cdiv(B, tb),)

    # Only CORE_PARALLEL actually changes codegen (splits the grid across both
    # v7x TensorCores + both HBM streams); "parallel" is the always-valid
    # single-TC fallback.
    if n_cores >= 2 and grid[0] >= 2:
        semantics = (pltpu.CORE_PARALLEL,)
    else:
        semantics = ("parallel",)

    # Advisory cost hint so XLA schedules around the custom call.
    cost = pl.CostEstimate(
        flops=2 * B * (D * HIDDEN + HIDDEN * HIDDEN),
        transcendentals=0,
        bytes_accessed=(B * D * x_bytes
                        + (D * HIDDEN + HIDDEN * HIDDEN) * w_bytes
                        + 2 * HIDDEN * 4
                        + B * HIDDEN * out_bytes),
    )

    def _call(single_buffer_params):
        # Params never change across grid steps -> request a single VMEM
        # buffer for them; the saved bytes go into a larger batch tile.
        pspec = ({"pipeline_mode": pl.Buffered(1)}
                 if single_buffer_params else {})
        return pl.pallas_call(
            _mlp_kernel,
            out_shape=jax.ShapeDtypeStruct((B, HIDDEN), out_dtype),
            grid_spec=pltpu.PrefetchScalarGridSpec(
                num_scalar_prefetch=0,
                grid=grid,
                in_specs=[
                    # x tile marches along the batch axis (double-buffered).
                    pl.BlockSpec((tb, D), lambda i: (i, 0)),
                    # Weights / biases: constant block index -> VMEM-resident.
                    pl.BlockSpec((D, HIDDEN), lambda i: (0, 0), **pspec),
                    pl.BlockSpec((1, HIDDEN), lambda i: (0, 0), **pspec),
                    pl.BlockSpec((HIDDEN, HIDDEN), lambda i: (0, 0), **pspec),
                    pl.BlockSpec((1, HIDDEN), lambda i: (0, 0), **pspec),
                ],
                out_specs=pl.BlockSpec((tb, HIDDEN), lambda i: (i, 0)),
            ),
            compiler_params=pltpu.CompilerParams(
                dimension_semantics=semantics,
                vmem_limit_bytes=vmem_limit_bytes,
            ),
            cost_estimate=cost,
        )(x2d, w1, b1, w2, b2)

    try:
        return _call(single_buffer_params=True)
    except Exception:
        # pipeline_mode / Buffered(1) unsupported on this jax version:
        # fall back to default double-buffered params (only costs VMEM).
        return _call(single_buffer_params=False)


if __name__ == "__main__":
    key = jax.random.PRNGKey(0)
    kx, kp = jax.random.split(key)

    batch = 8
    input_dim = 32  # flattened feature dim (x.view(B, -1))

    # bf16 inputs / weights; f32 accumulation inside the kernel; bf16 output.
    x = jax.random.normal(kx, (batch, input_dim), jnp.float32).astype(jnp.bfloat16)
    params = init_params(kp, input_dim, dtype=jnp.bfloat16)
    w1, b1, w2, b2 = params

    out = base_network_forward(x, params)
    out = jax.block_until_ready(out)
    assert out.shape == (batch, HIDDEN)

    # Reference in plain JAX with the identical precision path
    # (bf16 operands, f32 accumulation, f32 epilogue).
    x2d = x.reshape(batch, -1)
    ref_h = jnp.maximum(
        jnp.dot(x2d, w1, preferred_element_type=jnp.float32) + b1, 0.0)
    ref = jnp.maximum(
        jnp.dot(ref_h.astype(jnp.bfloat16), w2,
                preferred_element_type=jnp.float32) + b2, 0.0)

    err = float(jnp.max(jnp.abs(out.astype(jnp.float32) - ref)))
    assert jnp.allclose(out.astype(jnp.float32), ref, atol=2e-2, rtol=2e-2), err

    print("KERNEL_OK")
</pallas_src>

<mosaic_0001>
module attributes {stable_mosaic.version = 11 : i64} {
  func.func @_mlp_kernel(%arg0: i32, %arg1: memref<8x32xbf16, #tpu.memory_space<vmem>>, %arg2: memref<32x128xbf16, #tpu.memory_space<vmem>>, %arg3: memref<1x128xf32, #tpu.memory_space<vmem>>, %arg4: memref<128x128xbf16, #tpu.memory_space<vmem>>, %arg5: memref<1x128xf32, #tpu.memory_space<vmem>>, %arg6: memref<8x128xbf16, #tpu.memory_space<vmem>>) attributes {dimension_semantics = [#tpu.dimension_semantics<parallel>], iteration_bounds = array<i64: 1>, scalar_prefetch = 0 : i64, scratch_operands = 0 : i64, tpu.core_type = #tpu.core_type<tc>, window_params = [{transform_indices = @transform_0, window_bounds = array<i64: 8, 32>}, {pipeline_mode = #tpu.pipeline_mode<synchronous>, transform_indices = @transform_1, window_bounds = array<i64: 32, 128>}, {pipeline_mode = #tpu.pipeline_mode<synchronous>, transform_indices = @transform_2, window_bounds = array<i64: 1, 128>}, {pipeline_mode = #tpu.pipeline_mode<synchronous>, transform_indices = @transform_3, window_bounds = array<i64: 128, 128>}, {pipeline_mode = #tpu.pipeline_mode<synchronous>, transform_indices = @transform_4, window_bounds = array<i64: 1, 128>}, {transform_indices = @transform_5, window_bounds = array<i64: 8, 128>}]} {
    %c0 = arith.constant 0 : index
    %c0_0 = arith.constant 0 : index
    %0 = vector.load %arg1[%c0, %c0_0] : memref<8x32xbf16, #tpu.memory_space<vmem>>, vector<8x32xbf16>
    %c0_1 = arith.constant 0 : index
    %c0_2 = arith.constant 0 : index
    %1 = vector.load %arg2[%c0_1, %c0_2] : memref<32x128xbf16, #tpu.memory_space<vmem>>, vector<32x128xbf16>
    %cst = arith.constant dense<0.000000e+00> : vector<8x128xf32>
    %2 = tpu.matmul %0, %1, %cst {dimension_numbers = #tpu.dot_dimension_numbers<[1], [0], [0], [1], [0, 0, 1, 1], [], []>} : vector<8x32xbf16>, vector<32x128xbf16>, vector<8x128xf32> -> vector<8x128xf32>
    %c0_3 = arith.constant 0 : index
    %c0_4 = arith.constant 0 : index
    %3 = vector.load %arg3[%c0_3, %c0_4] : memref<1x128xf32, #tpu.memory_space<vmem>>, vector<1x128xf32>
    %4 = vector.broadcast %3 : vector<1x128xf32> to vector<8x128xf32>
    %5 = arith.addf %2, %4 : vector<8x128xf32>
    %cst_5 = arith.constant 0.000000e+00 : f32
    %6 = vector.broadcast %cst_5 : f32 to vector<8x128xf32>
    %7 = arith.maximumf %5, %6 : vector<8x128xf32>
    %8 = arith.truncf %7 : vector<8x128xf32> to vector<8x128xbf16>
    %c0_6 = arith.constant 0 : index
    %c0_7 = arith.constant 0 : index
    %9 = vector.load %arg4[%c0_6, %c0_7] : memref<128x128xbf16, #tpu.memory_space<vmem>>, vector<128x128xbf16>
    %cst_8 = arith.constant dense<0.000000e+00> : vector<8x128xf32>
    %10 = tpu.matmul %8, %9, %cst_8 {dimension_numbers = #tpu.dot_dimension_numbers<[1], [0], [0], [1], [0, 0, 1, 1], [], []>} : vector<8x128xbf16>, vector<128x128xbf16>, vector<8x128xf32> -> vector<8x128xf32>
    %c0_9 = arith.constant 0 : index
    %c0_10 = arith.constant 0 : index
    %11 = vector.load %arg5[%c0_9, %c0_10] : memref<1x128xf32, #tpu.memory_space<vmem>>, vector<1x128xf32>
    %12 = vector.broadcast %11 : vector<1x128xf32> to vector<8x128xf32>
    %13 = arith.addf %10, %12 : vector<8x128xf32>
    %cst_11 = arith.constant 0.000000e+00 : f32
    %14 = vector.broadcast %cst_11 : f32 to vector<8x128xf32>
    %15 = arith.maximumf %13, %14 : vector<8x128xf32>
    %16 = arith.truncf %15 : vector<8x128xf32> to vector<8x128xbf16>
    %c0_12 = arith.constant 0 : index
    %c0_13 = arith.constant 0 : index
    %17 = vector.load %arg6[%c0_12, %c0_13] : memref<8x128xbf16, #tpu.memory_space<vmem>>, vector<8x128xbf16>
    tpu.vector_store %arg6[%c0_12, %c0_13], %16 {strides = array<i32>} : memref<8x128xbf16, #tpu.memory_space<vmem>>, vector<8x128xbf16>,
    return
  }
  func.func @transform_0(%arg0: i32) -> (i32, i32) {
    %c0_i32 = arith.constant 0 : i32
    %c0_i32_0 = arith.constant 0 : i32
    return %arg0, %c0_i32 : i32, i32
  }
  func.func @transform_1(%arg0: i32) -> (i32, i32) {
    %c0_i32 = arith.constant 0 : i32
    %c0_i32_0 = arith.constant 0 : i32
    %c0_i32_1 = arith.constant 0 : i32
    return %c0_i32, %c0_i32_0 : i32, i32
  }
  func.func @transform_2(%arg0: i32) -> (i32, i32) {
    %c0_i32 = arith.constant 0 : i32
    %c0_i32_0 = arith.constant 0 : i32
    %c0_i32_1 = arith.constant 0 : i32
    return %c0_i32, %c0_i32_0 : i32, i32
  }
  func.func @transform_3(%arg0: i32) -> (i32, i32) {
    %c0_i32 = arith.constant 0 : i32
    %c0_i32_0 = arith.constant 0 : i32
    %c0_i32_1 = arith.constant 0 : i32
    return %c0_i32, %c0_i32_0 : i32, i32
  }
  func.func @transform_4(%arg0: i32) -> (i32, i32) {
    %c0_i32 = arith.constant 0 : i32
    %c0_i32_0 = arith.constant 0 : i32
    %c0_i32_1 = arith.constant 0 : i32
    return %c0_i32, %c0_i32_0 : i32, i32
  }
  func.func @transform_5(%arg0: i32) -> (i32, i32) {
    %c0_i32 = arith.constant 0 : i32
    %c0_i32_0 = arith.constant 0 : i32
    return %arg0, %c0_i32 : i32, i32
  }
}

module attributes {stable_mosaic.version = 11 : i64} {
  func.func @_mlp_kernel(%arg0: i32, %arg1: memref<8x32xbf16, #tpu.memory_space<vmem>>, %arg2: memref<32x128xbf16, #tpu.memory_space<vmem>>, %arg3: memref<1x128xf32, #tpu.memory_space<vmem>>, %arg4: memref<128x128xbf16, #tpu.memory_space<vmem>>, %arg5: memref<1x128xf32, #tpu.memory_space<vmem>>, %arg6: memref<8x128xbf16, #tpu.memory_space<vmem>>) attributes {dimension_semantics = [#tpu.dimension_semantics<parallel>], iteration_bounds = array<i64: 1>, scalar_prefetch = 0 : i64, scratch_operands = 0 : i64, tpu.core_type = #tpu.core_type<tc>, window_params = [{transform_indices = @transform_0, window_bounds = array<i64: 8, 32>}, {pipeline_mode = #tpu.pipeline_mode<synchronous>, transform_indices = @transform_1, window_bounds = array<i64: 32, 128>}, {pipeline_mode = #tpu.pipeline_mode<synchronous>, transform_indices = @transform_2, window_bounds = array<i64: 1, 128>}, {pipeline_mode = #tpu.pipeline_mode<synchronous>, transform_indices = @transform_3, window_bounds = array<i64: 128, 128>}, {pipeline_mode = #tpu.pipeline_mode<synchronous>, transform_indices = @transform_4, window_bounds = array<i64: 1, 128>}, {transform_indices = @transform_5, window_bounds = array<i64: 8, 128>}]} {
    %c0 = arith.constant 0 : index
    %c0_0 = arith.constant 0 : index
    %0 = vector.load %arg1[%c0, %c0_0] : memref<8x32xbf16, #tpu.memory_space<vmem>>, vector<8x32xbf16>
    %c0_1 = arith.constant 0 : index
    %c0_2 = arith.constant 0 : index
    %1 = vector.load %arg2[%c0_1, %c0_2] : memref<32x128xbf16, #tpu.memory_space<vmem>>, vector<32x128xbf16>
    %cst = arith.constant dense<0.000000e+00> : vector<8x128xf32>
    %2 = tpu.matmul %0, %1, %cst {dimension_numbers = #tpu.dot_dimension_numbers<[1], [0], [0], [1], [0, 0, 1, 1], [], []>} : vector<8x32xbf16>, vector<32x128xbf16>, vector<8x128xf32> -> vector<8x128xf32>
    %c0_3 = arith.constant 0 : index
    %c0_4 = arith.constant 0 : index
    %3 = vector.load %arg3[%c0_3, %c0_4] : memref<1x128xf32, #tpu.memory_space<vmem>>, vector<1x128xf32>
    %4 = vector.broadcast %3 : vector<1x128xf32> to vector<8x128xf32>
    %5 = arith.addf %2, %4 : vector<8x128xf32>
    %cst_5 = arith.constant 0.000000e+00 : f32
    %6 = vector.broadcast %cst_5 : f32 to vector<8x128xf32>
    %7 = arith.maximumf %5, %6 : vector<8x128xf32>
    %8 = arith.truncf %7 : vector<8x128xf32> to vector<8x128xbf16>
    %c0_6 = arith.constant 0 : index
    %c0_7 = arith.constant 0 : index
    %9 = vector.load %arg4[%c0_6, %c0_7] : memref<128x128xbf16, #tpu.memory_space<vmem>>, vector<128x128xbf16>
    %cst_8 = arith.constant dense<0.000000e+00> : vector<8x128xf32>
    %10 = tpu.matmul %8, %9, %cst_8 {dimension_numbers = #tpu.dot_dimension_numbers<[1], [0], [0], [1], [0, 0, 1, 1], [], []>} : vector<8x128xbf16>, vector<128x128xbf16>, vector<8x128xf32> -> vector<8x128xf32>
    %c0_9 = arith.constant 0 : index
    %c0_10 = arith.constant 0 : index
    %11 = vector.load %arg5[%c0_9, %c0_10] : memref<1x128xf32, #tpu.memory_space<vmem>>, vector<1x128xf32>
    %12 = vector.broadcast %11 : vector<1x128xf32> to vector<8x128xf32>
    %13 = arith.addf %10, %12 : vector<8x128xf32>
    %cst_11 = arith.constant 0.000000e+00 : f32
    %14 = vector.broadcast %cst_11 : f32 to vector<8x128xf32>
    %15 = arith.maximumf %13, %14 : vector<8x128xf32>
    %16 = arith.truncf %15 : vector<8x128xf32> to vector<8x128xbf16>
    %c0_12 = arith.constant 0 : index
    %c0_13 = arith.constant 0 : index
    %17 = vector.load %arg6[%c0_12, %c0_13] : memref<8x128xbf16, #tpu.memory_space<vmem>>, vector<8x128xbf16>
    tpu.vector_store %arg6[%c0_12, %c0_13], %16 {strides = array<i32>} : memref<8x128xbf16, #tpu.memory_space<vmem>>, vector<8x128xbf16>,
    return
  }
  func.func @transform_0(%arg0: i32) -> (i32, i32) {
    %c0_i32 = arith.constant 0 : i32
    %c0_i32_0 = arith.constant 0 : i32
    return %arg0, %c0_i32 : i32, i32
  }
  func.func @transform_1(%arg0: i32) -> (i32, i32) {
    %c0_i32 = arith.constant 0 : i32
    %c0_i32_0 = arith.constant 0 : i32
    %c0_i32_1 = arith.constant 0 : i32
    return %c0_i32, %c0_i32_0 : i32, i32
  }
  func.func @transform_2(%arg0: i32) -> (i32, i32) {
    %c0_i32 = arith.constant 0 : i32
    %c0_i32_0 = arith.constant 0 : i32
    %c0_i32_1 = arith.constant 0 : i32
    return %c0_i32, %c0_i32_0 : i32, i32
  }
  func.func @transform_3(%arg0: i32) -> (i32, i32) {
    %c0_i32 = arith.constant 0 : i32
    %c0_i32_0 = arith.constant 0 : i32
    %c0_i32_1 = arith.constant 0 : i32
    return %c0_i32, %c0_i32_0 : i32, i32
  }
  func.func @transform_4(%arg0: i32) -> (i32, i32) {
    %c0_i32 = arith.constant 0 : i32
    %c0_i32_0 = arith.constant 0 : i32
    %c0_i32_1 = arith.constant 0 : i32
    return %c0_i32, %c0_i32_0 : i32, i32
  }
  func.func @transform_5(%arg0: i32) -> (i32, i32) {
    %c0_i32 = arith.constant 0 : i32
    %c0_i32_0 = arith.constant 0 : i32
    return %arg0, %c0_i32 : i32, i32
  }
}

</mosaic_0001>

<bundles_post_ra>
// kernel: tpu_custom_call.1
= control target key start
LH: loop header
LB: loop body
LE: loop exit
PB: predicated region body
PF: predicated region fallthrough
CT: control target
= control target key end

     0   :  { %10 = vsyncpa [#allocation3], 0  ;;  %s474_s0 = inlined_call_operand.hbm [shape: bf16[8,32], index: 0, kind: input, shape index: {}]   ;;  %s475_s1 = inlined_call_operand.hbm [shape: bf16[32,128], index: 1, kind: input, shape index: {}]   ;;  %s476_s2 = inlined_call_operand.vmem [shape: f32[1,128], index: 2, kind: input, shape index: {}]   ;;  %s477_s3 = inlined_call_operand.hbm [shape: bf16[128,128], index: 3, kind: input, shape index: {}]   ;;  %s478_s4 = inlined_call_operand.vmem [shape: f32[1,128], index: 4, kind: input, shape index: {}]   ;;  %s479_s5 = inlined_call_operand.hbm [shape: bf16[8,128], index: 5, kind: output, shape index: {}]  }
   0x1   :  { %11 = vsyncpa [#allocation6], 0 }
   0x2   :  { %12 = vsyncpa [#allocation4], 0  ;;  %s418_s18 = smov [#allocation5]  }
   0x3   :  { %s28_s19 = sshll.u32 %s418_s18, 4  ;;  %s29_s19 = int_to_ptr.vmem [resolvable:$true] %s28_s19 }
   0x4   :  { %s340_s20 = scalar_lea.vmem %s29_s19, 256  ;;  %p345_p1 = scmp.lt.s32.totalorder %s29_s19, %s29_s19 }
   0x5   :  { %p341_p0 = scmp.ne.s32.totalorder %s29_s19, %s340_s20  ;;  %p346_p2 = scmp.lt.s32.totalorder %s340_s20, %s340_s20 }
   0x7   :  { %p347_p3 = por %p346_p2, %p345_p1 }
   0x9   :  { %p348_p4 = pnand %p347_p3, %p341_p0 }
   0xb   :  { %351 = shalt.err (!%p348_p4)
}
   0xc   :  { %s419_s21 = smov 64   ;;  %s420_s22 = smov 4  }
   0xd   :  { %34 = dma.hbm_to_vmem [thread:$0]  %s475_s1, 256, %s29_s19, [#allocation6], %s419_s21, %s419_s21, %s420_s22  }
   0xe   :  { %s421_s25 = smov [#allocation2]   ;;  %s422_s27 = smov [#allocation7]  }
   0xf   :  { %s19_s26 = sshll.u32 %s421_s25, 4  ;;  %s42_s28 = sshll.u32 %s422_s27, 4  ;;  %s20_s26 = int_to_ptr.vmem [resolvable:$true] %s19_s26  ;;  %s43_s28 = int_to_ptr.vmem [resolvable:$true] %s42_s28 }
  0x10   :  { %s360_s29 = scalar_lea.vmem %s20_s26, 64  ;;  %p365_p6 = scmp.lt.s32.totalorder %s20_s26, %s20_s26 }
  0x11   :  { %p361_p5 = scmp.ne.s32.totalorder %s20_s26, %s360_s29  ;;  %p366_p7 = scmp.lt.s32.totalorder %s360_s29, %s360_s29 }
  0x13   :  { %p367_p8 = por %p366_p7, %p365_p6 }
  0x15   :  { %p368_p9 = pnand %p367_p8, %p361_p5 }
  0x17   :  { %371 = shalt.err (!%p368_p9)
}
  0x18   :  { %22 = dma.hbm_to_vmem [thread:$0]  %s474_s0, 64, %s20_s26, [#allocation3]  }
  0x19   :  { %s380_s7 = scalar_lea.vmem %s43_s28, 1024  ;;  %p385_p11 = scmp.lt.s32.totalorder %s43_s28, %s43_s28 }
  0x1a   :  { %p381_p10 = scmp.ne.s32.totalorder %s43_s28, %s380_s7  ;;  %p386_p12 = scmp.lt.s32.totalorder %s380_s7, %s380_s7 }
  0x1c   :  { %p387_p13 = por %p386_p12, %p385_p11 }
  0x1e   :  { %p388_p0 = pnand %p387_p13, %p381_p10 }
  0x20   :  { %391 = shalt.err (!%p388_p0)
}
  0x21   :  { %48 = dma.hbm_to_vmem [thread:$0]  %s477_s3, 1024, %s43_s28, [#allocation6], %s419_s21, %s419_s21, %s420_s22  }
  0x22   :  { %412 = dma.done.wait [#allocation3], 64  }
  0x23   :  { %413 = vsyncadd [#allocation3], 4294967232 }
  0x24   :  { %414 = dma.done.wait [#allocation6], 1280  }
  0x25   :  { %415 = vsyncadd [#allocation6], 4294966016  ;;  %v423_v0 = vmov 0.0   ;;  %vm424_vm0 = vmmov 0   ;;  %v322_v1 = vld [vmem:[#allocation5 + $0x8] sm:$0xff]   ;;  %v323_v2 = vld [vmem:[#allocation5] sm:$0xff]  }
  0x26   :  { %286 = vmatprep.subr.bf16.mxu0 %v423_v0  ;;  %290 = vmatprep.mubr.msk.bf16.mxu0 %vm424_vm0, %v423_v0  ;;  %v324_v3 = vld [vmem:[#allocation7 + $0x38] sm:$0xff]   ;;  %vm85_vm1 = vcmask 261120   ;;  %v325_v4 = vld [vmem:[#allocation7 + $0x30] sm:$0xff]   ;;  %v61_v5 = vld [vmem:[#allocation2] sm:$0xf]  ;;  %s425_s11 = smov [#allocation8]  }
  0x27   :  { %294 = vmatprep.subr.bf16.mxu1 %v423_v0  ;;  %310 = vmatprep.mubr.msk.bf16.mxu1 %vm424_vm0, %v423_v0  ;;  %v326_v6 = vld [vmem:[#allocation7 + $0x28] sm:$0xff]   ;;  %v327_v7 = vld [vmem:[#allocation7 + $0x20] sm:$0xff]   ;;  %v328_v8 = vld [vmem:[#allocation7 + $0x18] sm:$0xff]   ;;  %s251_s12 = sshll.u32 %s425_s11, 4  ;;  %s252_s12 = int_to_ptr.vmem [resolvable:$true] %s251_s12 }
  0x28   :  { %287 = vmatpush3.bf16.msra.mxu0 %v322_v1  ;;  %295 = vmatpush3.bf16.msra.mxu1 %v324_v3  ;;  %v329_v9 = vld [vmem:[#allocation7 + $0x10] sm:$0xff]   ;;  %v330_v10 = vld [vmem:[#allocation7 + $0x8] sm:$0xff]   ;;  %v331_v11 = vld [vmem:[#allocation7] sm:$0xff]   ;;  %p397_p2 = scmp.lt.s32.totalorder %s252_s12, %s252_s12 }
  0x29   :  { %288 = vmatprep.subr.bf16.mxu0 %v423_v0  ;;  %296 = vmatprep.subr.bf16.mxu1 %v423_v0  ;;  %v261_v12 = vld [vmem:[%s476_s2] ss:$0 sm:$0xff]  ;;  %s392_s2 = scalar_lea.vmem %s252_s12, 64 }
  0x2a   :  { %v265_v20 = vld [vmem:[%s478_s4] ss:$0 sm:$0xff]  ;;  %p393_p1 = scmp.ne.s32.totalorder %s252_s12, %s392_s2  ;;  %p398_p3 = scmp.lt.s32.totalorder %s392_s2, %s392_s2 }
  0x2c   :  { %289 = vmatpush3.bf16.msra.mxu0 %v323_v2  ;;  %297 = vmatpush3.bf16.msra.mxu1 %v325_v4  ;;  %p399_p4 = por %p398_p3, %p397_p2 }
  0x2d   :  { %298 = vmatprep.subr.bf16.mxu1 %v423_v0 }
  0x2e   :  { %p400_p5 = pnand %p399_p4, %p393_p1 }
  0x2f   :  { %291 = vmatmul.mubr.msk.bf16.vlgmr.msra.gmra.mxu0 %vm85_vm1, %v61_v5 }
  0x30   :  { %299 = vmatpush3.bf16.msra.mxu1 %v326_v6 }
  0x31   :  { %300 = vmatprep.subr.bf16.mxu1 %v423_v0 }
  0x34   :  { %301 = vmatpush3.bf16.msra.mxu1 %v327_v7 }
  0x35   :  { %302 = vmatprep.subr.bf16.mxu1 %v423_v0 }
  0x38   :  { %303 = vmatpush3.bf16.msra.mxu1 %v328_v8 }
  0x39   :  { %304 = vmatprep.subr.bf16.mxu1 %v423_v0 }
  0x3c   :  { %305 = vmatpush3.bf16.msra.mxu1 %v329_v9 }
  0x3d   :  { %306 = vmatprep.subr.bf16.mxu1 %v423_v0 }
  0x40   :  { %307 = vmatpush3.bf16.msra.mxu1 %v330_v10 }
  0x41   :  { %308 = vmatprep.subr.bf16.mxu1 %v423_v0 }
  0x44   :  { %309 = vmatpush3.bf16.msra.mxu1 %v331_v11 }
  0xef   :  { %v123_v13 = vpop.f32.mrf.mxu0 }
  0xf0   :  { %v124_v14 = vadd.f32 %v261_v12, %v123_v13 }
  0xf1   :  { %v292_v15 = vpop.f32.mrf.mxu0 }
  0xf2   :  { %v129_v16 = vmax.f32 %v124_v14, 0.0 }
  0xf3   :  { %v126_v17 = vpop.f32.mrf.mxu0 }
  0xf4   :  { %v130_v18 = vpack.c.bf16 %v129_v16, %v129_v16 }
  0xf5   :  { %v293_v19 = vpop.f32.mrf.mxu0 }
  0xf6   :  { %311 = vmatmul.mubr.bf16.vlgmr.msra.gmra.mxu1 %v130_v18 }
 0x1b6   :  { %v236_v21 = vpop.f32.mrf.mxu1 }
 0x1b7   :  { %v237_v22 = vadd.f32 %v265_v20, %v236_v21 }
 0x1b8   :  { %v312_v23 = vpop.f32.mrf.mxu1 }
 0x1b9   :  { %v242_v24 = vmax.f32 %v237_v22, 0.0 }
 0x1ba   :  { %v239_v25 = vpop.f32.mrf.mxu1 }
 0x1bb   :  { %v243_v26 = vpack.c.bf16 %v242_v24, %v242_v24 }
 0x1bc   :  { %v313_v27 = vpop.f32.mrf.mxu1 }
 0x1bd   :  { %244 = vst [vmem:[#allocation8] sm:$0xf] %v243_v26 }
 0x1be   :  { %403 = shalt.err (!%p400_p5)
}
 0x1bf   :  { %254 = dma.vmem_to_hbm [thread:$0]  %s252_s12, 64, %s479_s5, [#allocation4]  }
 0x1c0   :  { %416 = dma.done.wait [#allocation4], 64  }
 0x1c1   :  { %417 = vsyncadd [#allocation4], 4294967232 }
 0x1c2   :  { %258 = vsyncpa [#allocation3], 1 }
 0x1c3   :  { %259 = vsyncpa [#allocation6], 1 }
 0x1c4   :  { %260 = vsyncpa [#allocation4], 1 }

// kernel: tpu_custom_call.1
= control target key start
LH: loop header
LB: loop body
LE: loop exit
PB: predicated region body
PF: predicated region fallthrough
CT: control target
= control target key end

     0   :  { %10 = vsyncpa [#allocation3], 0  ;;  %s474_s0 = inlined_call_operand.hbm [shape: bf16[8,32], index: 0, kind: input, shape index: {}]   ;;  %s475_s1 = inlined_call_operand.hbm [shape: bf16[32,128], index: 1, kind: input, shape index: {}]   ;;  %s476_s2 = inlined_call_operand.vmem [shape: f32[1,128], index: 2, kind: input, shape index: {}]   ;;  %s477_s3 = inlined_call_operand.hbm [shape: bf16[128,128], index: 3, kind: input, shape index: {}]   ;;  %s478_s4 = inlined_call_operand.vmem [shape: f32[1,128], index: 4, kind: input, shape index: {}]   ;;  %s479_s5 = inlined_call_operand.hbm [shape: bf16[8,128], index: 5, kind: output, shape index: {}]  }
   0x1   :  { %11 = vsyncpa [#allocation6], 0 }
   0x2   :  { %12 = vsyncpa [#allocation4], 0  ;;  %s418_s18 = smov [#allocation5]  }
   0x3   :  { %s28_s19 = sshll.u32 %s418_s18, 4  ;;  %s29_s19 = int_to_ptr.vmem [resolvable:$true] %s28_s19 }
   0x4   :  { %s340_s20 = scalar_lea.vmem %s29_s19, 256  ;;  %p345_p1 = scmp.lt.s32.totalorder %s29_s19, %s29_s19 }
   0x5   :  { %p341_p0 = scmp.ne.s32.totalorder %s29_s19, %s340_s20  ;;  %p346_p2 = scmp.lt.s32.totalorder %s340_s20, %s340_s20 }
   0x7   :  { %p347_p3 = por %p346_p2, %p345_p1 }
   0x9   :  { %p348_p4 = pnand %p347_p3, %p341_p0 }
   0xb   :  { %351 = shalt.err (!%p348_p4)
}
   0xc   :  { %s419_s21 = smov 64   ;;  %s420_s22 = smov 4  }
   0xd   :  { %34 = dma.hbm_to_vmem [thread:$0]  %s475_s1, 256, %s29_s19, [#allocation6], %s419_s21, %s419_s21, %s420_s22  }
   0xe   :  { %s421_s25 = smov [#allocation2]   ;;  %s422_s27 = smov [#allocation7]  }
   0xf   :  { %s19_s26 = sshll.u32 %s421_s25, 4  ;;  %s42_s28 = sshll.u32 %s422_s27, 4  ;;  %s20_s26 = int_to_ptr.vmem [resolvable:$true] %s19_s26  ;;  %s43_s28 = int_to_ptr.vmem [resolvable:$true] %s42_s28 }
  0x10   :  { %s360_s29 = scalar_lea.vmem %s20_s26, 64  ;;  %p365_p6 = scmp.lt.s32.totalorder %s20_s26, %s20_s26 }
  0x11   :  { %p361_p5 = scmp.ne.s32.totalorder %s20_s26, %s360_s29  ;;  %p366_p7 = scmp.lt.s32.totalorder %s360_s29, %s360_s29 }
  0x13   :  { %p367_p8 = por %p366_p7, %p365_p6 }
  0x15   :  { %p368_p9 = pnand %p367_p8, %p361_p5 }
  0x17   :  { %371 = shalt.err (!%p368_p9)
}
  0x18   :  { %22 = dma.hbm_to_vmem [thread:$0]  %s474_s0, 64, %s20_s26, [#allocation3]  }
  0x19   :  { %s380_s7 = scalar_lea.vmem %s43_s28, 1024  ;;  %p385_p11 = scmp.lt.s32.totalorder %s43_s28, %s43_s28 }
  0x1a   :  { %p381_p10 = scmp.ne.s32.totalorder %s43_s28, %s380_s7  ;;  %p386_p12 = scmp.lt.s32.totalorder %s380_s7, %s380_s7 }
  0x1c   :  { %p387_p13 = por %p386_p12, %p385_p11 }
  0x1e   :  { %p388_p0 = pnand %p387_p13, %p381_p10 }
  0x20   :  { %391 = shalt.err (!%p388_p0)
}
  0x21   :  { %48 = dma.hbm_to_vmem [thread:$0]  %s477_s3, 1024, %s43_s28, [#allocation6], %s419_s21, %s419_s21, %s420_s22  }
  0x22   :  { %412 = dma.done.wait [#allocation3], 64  }
  0x23   :  { %413 = vsyncadd [#allocation3], 4294967232 }
  0x24   :  { %414 = dma.done.wait [#allocation6], 1280  }
  0x25   :  { %415 = vsyncadd [#allocation6], 4294966016  ;;  %v423_v0 = vmov 0.0   ;;  %vm424_vm0 = vmmov 0   ;;  %v322_v1 = vld [vmem:[#allocation5 + $0x8] sm:$0xff]   ;;  %v323_v2 = vld [vmem:[#allocation5] sm:$0xff]  }
  0x26   :  { %286 = vmatprep.subr.bf16.mxu0 %v423_v0  ;;  %290 = vmatprep.mubr.msk.bf16.mxu0 %vm424_vm0, %v423_v0  ;;  %v324_v3 = vld [vmem:[#allocation7 + $0x38] sm:$0xff]   ;;  %vm85_vm1 = vcmask 261120   ;;  %v325_v4 = vld [vmem:[#allocation7 + $0x30] sm:$0xff]   ;;  %v61_v5 = vld [vmem:[#allocation2] sm:$0xf]  ;;  %s425_s11 = smov [#allocation8]  }
  0x27   :  { %294 = vmatprep.subr.bf16.mxu1 %v423_v0  ;;  %310 = vmatprep.mubr.msk.bf16.mxu1 %vm424_vm0, %v423_v0  ;;  %v326_v6 = vld [vmem:[#allocation7 + $0x28] sm:$0xff]   ;;  %v327_v7 = vld [vmem:[#allocation7 + $0x20] sm:$0xff]   ;;  %v328_v8 = vld [vmem:[#allocation7 + $0x18] sm:$0xff]   ;;  %s251_s12 = sshll.u32 %s425_s11, 4  ;;  %s252_s12 = int_to_ptr.vmem [resolvable:$true] %s251_s12 }
  0x28   :  { %287 = vmatpush3.bf16.msra.mxu0 %v322_v1  ;;  %295 = vmatpush3.bf16.msra.mxu1 %v324_v3  ;;  %v329_v9 = vld [vmem:[#allocation7 + $0x10] sm:$0xff]   ;;  %v330_v10 = vld [vmem:[#allocation7 + $0x8] sm:$0xff]   ;;  %v331_v11 = vld [vmem:[#allocation7] sm:$0xff]   ;;  %p397_p2 = scmp.lt.s32.totalorder %s252_s12, %s252_s12 }
  0x29   :  { %288 = vmatprep.subr.bf16.mxu0 %v423_v0  ;;  %296 = vmatprep.subr.bf16.mxu1 %v423_v0  ;;  %v261_v12 = vld [vmem:[%s476_s2] ss:$0 sm:$0xff]  ;;  %s392_s2 = scalar_lea.vmem %s252_s12, 64 }
  0x2a   :  { %v265_v20 = vld [vmem:[%s478_s4] ss:$0 sm:$0xff]  ;;  %p393_p1 = scmp.ne.s32.totalorder %s252_s12, %s392_s2  ;;  %p398_p3 = scmp.lt.s32.totalorder %s392_s2, %s392_s2 }
  0x2c   :  { %289 = vmatpush3.bf16.msra.mxu0 %v323_v2  ;;  %297 = vmatpush3.bf16.msra.mxu1 %v325_v4  ;;  %p399_p4 = por %p398_p3, %p397_p2 }
  0x2d   :  { %298 = vmatprep.subr.bf16.mxu1 %v423_v0 }
  0x2e   :  { %p400_p5 = pnand %p399_p4, %p393_p1 }
  0x2f   :  { %291 = vmatmul.mubr.msk.bf16.vlgmr.msra.gmra.mxu0 %vm85_vm1, %v61_v5 }
  0x30   :  { %299 = vmatpush3.bf16.msra.mxu1 %v326_v6 }
  0x31   :  { %300 = vmatprep.subr.bf16.mxu1 %v423_v0 }
  0x34   :  { %301 = vmatpush3.bf16.msra.mxu1 %v327_v7 }
  0x35   :  { %302 = vmatprep.subr.bf16.mxu1 %v423_v0 }
  0x38   :  { %303 = vmatpush3.bf16.msra.mxu1 %v328_v8 }
  0x39   :  { %304 = vmatprep.subr.bf16.mxu1 %v423_v0 }
  0x3c   :  { %305 = vmatpush3.bf16.msra.mxu1 %v329_v9 }
  0x3d   :  { %306 = vmatprep.subr.bf16.mxu1 %v423_v0 }
  0x40   :  { %307 = vmatpush3.bf16.msra.mxu1 %v330_v10 }
  0x41   :  { %308 = vmatprep.subr.bf16.mxu1 %v423_v0 }
  0x44   :  { %309 = vmatpush3.bf16.msra.mxu1 %v331_v11 }
  0xef   :  { %v123_v13 = vpop.f32.mrf.mxu0 }
  0xf0   :  { %v124_v14 = vadd.f32 %v261_v12, %v123_v13 }
  0xf1   :  { %v292_v15 = vpop.f32.mrf.mxu0 }
  0xf2   :  { %v129_v16 = vmax.f32 %v124_v14, 0.0 }
  0xf3   :  { %v126_v17 = vpop.f32.mrf.mxu0 }
  0xf4   :  { %v130_v18 = vpack.c.bf16 %v129_v16, %v129_v16 }
  0xf5   :  { %v293_v19 = vpop.f32.mrf.mxu0 }
  0xf6   :  { %311 = vmatmul.mubr.bf16.vlgmr.msra.gmra.mxu1 %v130_v18 }
 0x1b6   :  { %v236_v21 = vpop.f32.mrf.mxu1 }
 0x1b7   :  { %v237_v22 = vadd.f32 %v265_v20, %v236_v21 }
 0x1b8   :  { %v312_v23 = vpop.f32.mrf.mxu1 }
 0x1b9   :  { %v242_v24 = vmax.f32 %v237_v22, 0.0 }
 0x1ba   :  { %v239_v25 = vpop.f32.mrf.mxu1 }
 0x1bb   :  { %v243_v26 = vpack.c.bf16 %v242_v24, %v242_v24 }
 0x1bc   :  { %v313_v27 = vpop.f32.mrf.mxu1 }
 0x1bd   :  { %244 = vst [vmem:[#allocation8] sm:$0xf] %v243_v26 }
 0x1be   :  { %403 = shalt.err (!%p400_p5)
}
 0x1bf   :  { %254 = dma.vmem_to_hbm [thread:$0]  %s252_s12, 64, %s479_s5, [#allocation4]  }
 0x1c0   :  { %416 = dma.done.wait [#allocation4], 64  }
 0x1c1   :  { %417 = vsyncadd [#allocation4], 4294967232 }
 0x1c2   :  { %258 = vsyncpa [#allocation3], 1 }
 0x1c3   :  { %259 = vsyncpa [#allocation6], 1 }
 0x1c4   :  { %260 = vsyncpa [#allocation4], 1 }

</bundles_post_ra>
